<compile_context>
chip_gen: v5e
topology: v5e:2x2
jax: 0.10.0
libtpu: 0.0.40
codegen_flags: <defaults>
</compile_context>

<pallas_src>
import functools

import jax
import jax.numpy as jnp
from jax.experimental import pallas as pl
from jax.experimental.pallas import tpu as pltpu

KSIZE = 4  # Conv1d kernel_size=4, stride=1, padding=1  ->  L_out = L_in - 1


# --------------------------------------------------------------------------- #
# Kernel
# --------------------------------------------------------------------------- #
def _conv_relu_max_kernel(x_ref, w_ref, b_ref, y_ref, u_ref, *, tb, lp_in, l_out):
    """One (cout-tile, batch-block) grid step.

    x_ref: (TB*(L_in+2), C_in)       flat zero-padded activations (compute dtype)
    w_ref: (KSIZE, C_in, TILE_N)     conv weight tile, tap-major (compute dtype)
    b_ref: (1, TILE_N)               bias tile (f32)
    y_ref: (TB*(L_out+2), TILE_N)    next layer's flat zero-padded input
    u_ref: (TB, TILE_N)              max over length of ReLU(conv) (f32)
    """
    lp_out = l_out + 2
    tile_n = y_ref.shape[-1]
    m = tb * lp_in - (KSIZE - 1)  # flattened conv rows (incl. a few inter-batch garbage rows)

    # 4 shifted-window MXU matmuls over the flattened (batch*length) M axis,
    # f32 accumulation; bias added once via an implicit lane broadcast.
    acc = jnp.dot(x_ref[pl.ds(0, m), :], w_ref[0],
                  preferred_element_type=jnp.float32)
    for k in range(1, KSIZE):
        acc = acc + jnp.dot(x_ref[pl.ds(k, m), :], w_ref[k],
                            preferred_element_type=jnp.float32)
    y = jnp.maximum(acc + b_ref[...], 0.0)  # (m, tile_n), f32

    # Write the output already zero-padded ([0, y_0..y_{Lout-1}, 0] per batch):
    # zero-fill the block once, then store each batch's valid rows.
    y_ref[...] = jnp.zeros(y_ref.shape, y_ref.dtype)
    for t in range(tb):
        rows = y[t * lp_in:t * lp_in + l_out, :]       # valid conv rows of batch t
        u_ref[pl.ds(t, 1), :] = jnp.max(rows, axis=0, keepdims=True).astype(u_ref.dtype)
        y_ref[pl.ds(t * lp_out + 1, l_out), :] = rows.astype(y_ref.dtype)


# --------------------------------------------------------------------------- #
# Tiling heuristics
# --------------------------------------------------------------------------- #
def _choose_tile_n(cout, max_tile=256):
    """Output-channel tile: multiple of 128 (lane-dense, MXU-friendly) or full."""
    if cout <= max_tile:
        return cout
    t = (max_tile // 128) * 128
    while t >= 128:
        if cout % t == 0:
            return t
        t -= 128
    return cout  # no 128-multiple divisor; fall back to the full dim


def _choose_batch_block(batch, lp_in, cin, itemsize, target_m=512,
                        max_block_bytes=8 << 20):
    """Batch block TB: B % TB == 0 and (TB == B or TB % 8 == 0) so block shapes
    respect the (8, 128) rule; pick the smallest TB whose flattened M reaches
    target_m, capped so the input block stays comfortably inside VMEM."""
    valid = [tb for tb in range(1, batch + 1)
             if batch % tb == 0 and (tb == batch or tb % 8 == 0)]
    for tb in valid:
        if tb * lp_in * cin * itemsize > max_block_bytes:
            break
        if tb * lp_in - (KSIZE - 1) >= target_m:
            return tb
    fitting = [tb for tb in valid if tb * lp_in * cin * itemsize <= max_block_bytes]
    return fitting[-1] if fitting else valid[0]


# --------------------------------------------------------------------------- #
# Per-layer wrapper
# --------------------------------------------------------------------------- #
def _conv_relu_max_layer(x_flat, w, b, *, batch, l_in, compute_dtype,
                         tile_n_max=256, target_m=512):
    """x_flat: (B*(L_in+2), C_in) flat zero-padded activations.
    Returns (y_flat, u): y_flat is (B*(L_out+2), C_out) flat zero-padded output
    (the next layer's input), u is (B, C_out) = max over length of ReLU(conv)."""
    lp_in = l_in + 2
    l_out = l_in - 1
    lp_out = l_out + 2
    cin = x_flat.shape[1]
    cout = w.shape[2]

    tile_n = _choose_tile_n(cout, tile_n_max)
    tb = _choose_batch_block(batch, lp_in, cin,
                             jnp.dtype(compute_dtype).itemsize, target_m=target_m)
    grid = (cout // tile_n, batch // tb)  # weight tile = slowest axis -> reused over batch

    w_c = w.astype(compute_dtype)         # bf16 weights halve the dominant HBM traffic
    b2 = b.reshape(1, cout).astype(jnp.float32)

    flops = 2 * KSIZE * batch * l_out * cin * cout
    bytes_accessed = (
        x_flat.size * x_flat.dtype.itemsize * grid[0]               # acts re-read per cout tile
        + KSIZE * cin * cout * jnp.dtype(compute_dtype).itemsize    # each weight tile read once
        + batch * lp_out * cout * jnp.dtype(compute_dtype).itemsize # y writeback
        + batch * cout * 4)                                         # pooled features

    kernel = functools.partial(_conv_relu_max_kernel, tb=tb, lp_in=lp_in, l_out=l_out)

    y_flat, u = pl.pallas_call(
        kernel,
        out_shape=(
            jax.ShapeDtypeStruct((batch * lp_out, cout), compute_dtype),
            jax.ShapeDtypeStruct((batch, cout), jnp.float32),
        ),
        grid=grid,
        in_specs=[
            pl.BlockSpec((tb * lp_in, cin), lambda j, i: (i, 0)),
            pl.BlockSpec((KSIZE, cin, tile_n), lambda j, i: (0, 0, j)),
            pl.BlockSpec((1, tile_n), lambda j, i: (0, j)),
        ],
        out_specs=(
            pl.BlockSpec((tb * lp_out, tile_n), lambda j, i: (i, j)),
            pl.BlockSpec((tb, tile_n), lambda j, i: (i, j)),
        ),
        compiler_params=pltpu.CompilerParams(
            dimension_semantics=("parallel", "parallel")),
        cost_estimate=pl.CostEstimate(
            flops=flops, transcendentals=0, bytes_accessed=bytes_accessed),
    )(x_flat, w_c, b2)
    return y_flat, u


# --------------------------------------------------------------------------- #
# Full forward (matches ConvNetEncoder2.forward semantics)
# --------------------------------------------------------------------------- #
def convnet_encoder2_forward(params, sent, sent_len=None, *, compute_dtype=jnp.bfloat16):
    """sent: (seq_len, bsize, word_emb_dim) — same convention as the PyTorch
    module.  sent_len is unused by the reference forward pass."""
    del sent_len
    seq_len, batch, _ = sent.shape
    n_layers = len(params)
    if seq_len < n_layers + 1:  # each conv layer shrinks L by 1; need L_out >= 1
        raise ValueError(f"seq_len must be >= {n_layers + 1}, got {seq_len}")

    x = jnp.transpose(sent, (1, 0, 2)).astype(compute_dtype)       # (B, L, C)
    # Build the flat zero-padded layout ONCE; later layers get it for free
    # because every kernel writes its output already zero-padded.
    x_flat = jnp.pad(x, ((0, 0), (1, 1), (0, 0))).reshape(batch * (seq_len + 2), -1)

    pooled = []
    l_in = seq_len
    for (w, b) in params:
        x_flat, u = _conv_relu_max_layer(x_flat, w, b, batch=batch, l_in=l_in,
                                         compute_dtype=compute_dtype)
        pooled.append(u)
        l_in -= 1
    return jnp.concatenate(pooled, axis=1)                          # (B, 8*enc_lstm_dim) f32


def init_params(key, word_emb_dim, enc_lstm_dim):
    """Deterministic PyTorch-style Conv1d init (U(-1/sqrt(fan_in), 1/sqrt(fan_in))).
    Weights are stored as (K, C_in, C_out); the wrapper casts to bf16 per call
    (in production you would pre-cast the weights once)."""
    h2 = 2 * enc_lstm_dim
    dims = [(word_emb_dim, h2), (h2, h2), (h2, h2), (h2, h2)]
    params = []
    for (cin, cout) in dims:
        key, kw, kb = jax.random.split(key, 3)
        bound = 1.0 / jnp.sqrt(cin * KSIZE)
        w_pt = jax.random.uniform(kw, (cout, cin, KSIZE), jnp.float32, -bound, bound)
        w = jnp.transpose(w_pt, (2, 1, 0))                          # (K, C_in, C_out)
        b = jax.random.uniform(kb, (cout,), jnp.float32, -bound, bound)
        params.append((w, b))
    return params


def _reference_forward(params, sent, compute_dtype=jnp.float32):
    """Pure-JAX reference with the same dtype policy (operands in compute_dtype,
    f32 accumulation) for correctness checking."""
    x = jnp.transpose(sent, (1, 0, 2)).astype(compute_dtype)
    pooled = []
    for (w, b) in params:
        bsz, l, _ = x.shape
        l_out = l - 1
        xp = jnp.pad(x, ((0, 0), (1, 1), (0, 0)))
        wc = w.astype(compute_dtype)
        acc = jnp.zeros((bsz, l_out, w.shape[2]), jnp.float32)
        for k in range(KSIZE):
            acc = acc + jnp.einsum("blc,cd->bld", xp[:, k:k + l_out, :], wc[k],
                                   preferred_element_type=jnp.float32)
        y = jnp.maximum(acc + b[None, None, :], 0.0)
        pooled.append(jnp.max(y, axis=1))
        x = y.astype(compute_dtype)
    return jnp.concatenate(pooled, axis=1)


if __name__ == "__main__":
    # Small config consistent with the module's forward.
    config = {"bsize": 2, "word_emb_dim": 32, "enc_lstm_dim": 16, "pool_type": "max"}
    seq_len = 8

    key = jax.random.PRNGKey(0)
    key, k_sent = jax.random.split(key)
    sent = jax.random.normal(
        k_sent, (seq_len, config["bsize"], config["word_emb_dim"]), jnp.float32)
    sent_len = jnp.full((config["bsize"],), seq_len, jnp.int32)     # unused by forward

    params = init_params(key, config["word_emb_dim"], config["enc_lstm_dim"])

    emb = jax.jit(convnet_encoder2_forward)(params, sent, sent_len)
    emb = jax.block_until_ready(emb)

    assert emb.shape == (config["bsize"], 8 * config["enc_lstm_dim"]), emb.shape

    # Check against a reference using the same mixed precision (bf16 MXU
    # operands, f32 accumulation) ...
    ref_bf16 = _reference_forward(params, sent, compute_dtype=jnp.bfloat16)
    assert jnp.allclose(emb, ref_bf16, atol=2e-2, rtol=2e-2), "mismatch vs bf16 reference"
    # ... and loosely against full-f32 math (bf16 rounding only).
    ref_f32 = _reference_forward(params, sent, compute_dtype=jnp.float32)
    assert jnp.allclose(emb, ref_f32, atol=6e-2, rtol=6e-2), "mismatch vs f32 reference"

    print("KERNEL_OK")
</pallas_src>

<mosaic_0001>
module attributes {stable_mosaic.version = 11 : i64} {
  func.func @_conv_relu_max_kernel(%arg0: i32, %arg1: i32, %arg2: memref<20x32xbf16, #tpu.memory_space<vmem>>, %arg3: memref<4x32x32xbf16, #tpu.memory_space<vmem>>, %arg4: memref<1x32xf32, #tpu.memory_space<vmem>>, %arg5: memref<18x32xbf16, #tpu.memory_space<vmem>>, %arg6: memref<2x32xf32, #tpu.memory_space<vmem>>) attributes {dimension_semantics = [#tpu.dimension_semantics<parallel>, #tpu.dimension_semantics<parallel>], iteration_bounds = array<i64: 1, 1>, scalar_prefetch = 0 : i64, scratch_operands = 0 : i64, tpu.core_type = #tpu.core_type<tc>, window_params = [{transform_indices = @transform_0, window_bounds = array<i64: 20, 32>}, {transform_indices = @transform_1, window_bounds = array<i64: 4, 32, 32>}, {transform_indices = @transform_2, window_bounds = array<i64: 1, 32>}, {transform_indices = @transform_3, window_bounds = array<i64: 18, 32>}, {transform_indices = @transform_4, window_bounds = array<i64: 2, 32>}]} {
    %c0 = arith.constant 0 : index
    %c0_0 = arith.constant 0 : index
    %0 = vector.load %arg2[%c0, %c0_0] : memref<20x32xbf16, #tpu.memory_space<vmem>>, vector<17x32xbf16>
    %c0_1 = arith.constant 0 : index
    %c0_2 = arith.constant 0 : index
    %c0_3 = arith.constant 0 : index
    %1 = vector.load %arg3[%c0_1, %c0_2, %c0_3] : memref<4x32x32xbf16, #tpu.memory_space<vmem>>, vector<1x32x32xbf16>
    %2 = vector.shape_cast %1 : vector<1x32x32xbf16> to vector<32x32xbf16>
    %cst = arith.constant dense<0.000000e+00> : vector<17x32xf32>
    %3 = tpu.matmul %0, %2, %cst {dimension_numbers = #tpu.dot_dimension_numbers<[1], [0], [0], [1], [0, 0, 1, 1], [], []>} : vector<17x32xbf16>, vector<32x32xbf16>, vector<17x32xf32> -> vector<17x32xf32>
    %c1 = arith.constant 1 : index
    %c0_4 = arith.constant 0 : index
    %4 = vector.load %arg2[%c1, %c0_4] : memref<20x32xbf16, #tpu.memory_space<vmem>>, vector<17x32xbf16>
    %c1_5 = arith.constant 1 : index
    %c0_6 = arith.constant 0 : index
    %c0_7 = arith.constant 0 : index
    %5 = vector.load %arg3[%c1_5, %c0_6, %c0_7] : memref<4x32x32xbf16, #tpu.memory_space<vmem>>, vector<1x32x32xbf16>
    %6 = vector.shape_cast %5 : vector<1x32x32xbf16> to vector<32x32xbf16>
    %cst_8 = arith.constant dense<0.000000e+00> : vector<17x32xf32>
    %7 = tpu.matmul %4, %6, %cst_8 {dimension_numbers = #tpu.dot_dimension_numbers<[1], [0], [0], [1], [0, 0, 1, 1], [], []>} : vector<17x32xbf16>, vector<32x32xbf16>, vector<17x32xf32> -> vector<17x32xf32>
    %8 = arith.addf %3, %7 : vector<17x32xf32>
    %c2 = arith.constant 2 : index
    %c0_9 = arith.constant 0 : index
    %9 = vector.load %arg2[%c2, %c0_9] : memref<20x32xbf16, #tpu.memory_space<vmem>>, vector<17x32xbf16>
    %c2_10 = arith.constant 2 : index
    %c0_11 = arith.constant 0 : index
    %c0_12 = arith.constant 0 : index
    %10 = vector.load %arg3[%c2_10, %c0_11, %c0_12] : memref<4x32x32xbf16, #tpu.memory_space<vmem>>, vector<1x32x32xbf16>
    %11 = vector.shape_cast %10 : vector<1x32x32xbf16> to vector<32x32xbf16>
    %cst_13 = arith.constant dense<0.000000e+00> : vector<17x32xf32>
    %12 = tpu.matmul %9, %11, %cst_13 {dimension_numbers = #tpu.dot_dimension_numbers<[1], [0], [0], [1], [0, 0, 1, 1], [], []>} : vector<17x32xbf16>, vector<32x32xbf16>, vector<17x32xf32> -> vector<17x32xf32>
    %13 = arith.addf %8, %12 : vector<17x32xf32>
    %c3 = arith.constant 3 : index
    %c0_14 = arith.constant 0 : index
    %14 = vector.load %arg2[%c3, %c0_14] : memref<20x32xbf16, #tpu.memory_space<vmem>>, vector<17x32xbf16>
    %c3_15 = arith.constant 3 : index
    %c0_16 = arith.constant 0 : index
    %c0_17 = arith.constant 0 : index
    %15 = vector.load %arg3[%c3_15, %c0_16, %c0_17] : memref<4x32x32xbf16, #tpu.memory_space<vmem>>, vector<1x32x32xbf16>
    %16 = vector.shape_cast %15 : vector<1x32x32xbf16> to vector<32x32xbf16>
    %cst_18 = arith.constant dense<0.000000e+00> : vector<17x32xf32>
    %17 = tpu.matmul %14, %16, %cst_18 {dimension_numbers = #tpu.dot_dimension_numbers<[1], [0], [0], [1], [0, 0, 1, 1], [], []>} : vector<17x32xbf16>, vector<32x32xbf16>, vector<17x32xf32> -> vector<17x32xf32>
    %18 = arith.addf %13, %17 : vector<17x32xf32>
    %c0_19 = arith.constant 0 : index
    %c0_20 = arith.constant 0 : index
    %19 = vector.load %arg4[%c0_19, %c0_20] : memref<1x32xf32, #tpu.memory_space<vmem>>, vector<1x32xf32>
    %20 = vector.broadcast %19 : vector<1x32xf32> to vector<17x32xf32>
    %21 = arith.addf %18, %20 : vector<17x32xf32>
    %cst_21 = arith.constant 0.000000e+00 : f32
    %22 = vector.broadcast %cst_21 : f32 to vector<17x32xf32>
    %23 = arith.maximumf %21, %22 : vector<17x32xf32>
    %cst_22 = arith.constant 0.000000e+00 : bf16
    %24 = vector.broadcast %cst_22 : bf16 to vector<18x32xbf16>
    %c0_23 = arith.constant 0 : index
    %c0_24 = arith.constant 0 : index
    %25 = vector.load %arg5[%c0_23, %c0_24] : memref<18x32xbf16, #tpu.memory_space<vmem>>, vector<18x32xbf16>
    tpu.vector_store %arg5[%c0_23, %c0_24], %24 {strides = array<i32>} : memref<18x32xbf16, #tpu.memory_space<vmem>>, vector<18x32xbf16>,
    %26 = vector.extract_strided_slice %23 {offsets = [0, 0], sizes = [7, 32], strides = [1, 1]} : vector<17x32xf32> to vector<7x32xf32>
    %cst_25 = arith.constant dense<0xFF800000> : vector<32xf32>
    %27 = vector.multi_reduction <maximumf>, %26, %cst_25 [0] : vector<7x32xf32> to vector<32xf32>
    %28 = vector.shape_cast %27 : vector<32xf32> to vector<1x32xf32>
    %c0_26 = arith.constant 0 : index
    %c0_27 = arith.constant 0 : index
    %29 = vector.load %arg6[%c0_26, %c0_27] : memref<2x32xf32, #tpu.memory_space<vmem>>, vector<1x32xf32>
    tpu.vector_store %arg6[%c0_26, %c0_27], %28 {strides = array<i32>} : memref<2x32xf32, #tpu.memory_space<vmem>>, vector<1x32xf32>,
    %30 = arith.truncf %26 : vector<7x32xf32> to vector<7x32xbf16>
    %c1_28 = arith.constant 1 : index
    %c0_29 = arith.constant 0 : index
    %31 = vector.load %arg5[%c1_28, %c0_29] : memref<18x32xbf16, #tpu.memory_space<vmem>>, vector<7x32xbf16>
    tpu.vector_store %arg5[%c1_28, %c0_29], %30 {strides = array<i32>} : memref<18x32xbf16, #tpu.memory_space<vmem>>, vector<7x32xbf16>,
    %32 = vector.extract_strided_slice %23 {offsets = [10, 0], sizes = [7, 32], strides = [1, 1]} : vector<17x32xf32> to vector<7x32xf32>
    %cst_30 = arith.constant dense<0xFF800000> : vector<32xf32>
    %33 = vector.multi_reduction <maximumf>, %32, %cst_30 [0] : vector<7x32xf32> to vector<32xf32>
    %34 = vector.shape_cast %33 : vector<32xf32> to vector<1x32xf32>
    %c1_31 = arith.constant 1 : index
    %c0_32 = arith.constant 0 : index
    %35 = vector.load %arg6[%c1_31, %c0_32] : memref<2x32xf32, #tpu.memory_space<vmem>>, vector<1x32xf32>
    tpu.vector_store %arg6[%c1_31, %c0_32], %34 {strides = array<i32>} : memref<2x32xf32, #tpu.memory_space<vmem>>, vector<1x32xf32>,
    %36 = arith.truncf %32 : vector<7x32xf32> to vector<7x32xbf16>
    %c10 = arith.constant 10 : index
    %c0_33 = arith.constant 0 : index
    %37 = vector.load %arg5[%c10, %c0_33] : memref<18x32xbf16, #tpu.memory_space<vmem>>, vector<7x32xbf16>
    tpu.vector_store %arg5[%c10, %c0_33], %36 {strides = array<i32>} : memref<18x32xbf16, #tpu.memory_space<vmem>>, vector<7x32xbf16>,
    return
  }
  func.func @transform_0(%arg0: i32, %arg1: i32) -> (i32, i32) {
    %c0_i32 = arith.constant 0 : i32
    %c0_i32_0 = arith.constant 0 : i32
    return %arg1, %c0_i32 : i32, i32
  }
  func.func @transform_1(%arg0: i32, %arg1: i32) -> (i32, i32, i32) {
    %c0_i32 = arith.constant 0 : i32
    %c0_i32_0 = arith.constant 0 : i32
    %c0_i32_1 = arith.constant 0 : i32
    return %c0_i32, %c0_i32_0, %arg0 : i32, i32, i32
  }
  func.func @transform_2(%arg0: i32, %arg1: i32) -> (i32, i32) {
    %c0_i32 = arith.constant 0 : i32
    %c0_i32_0 = arith.constant 0 : i32
    return %c0_i32, %arg0 : i32, i32
  }
  func.func @transform_3(%arg0: i32, %arg1: i32) -> (i32, i32) {
    %c0_i32 = arith.constant 0 : i32
    return %arg1, %arg0 : i32, i32
  }
  func.func @transform_4(%arg0: i32, %arg1: i32) -> (i32, i32) {
    %c0_i32 = arith.constant 0 : i32
    return %arg1, %arg0 : i32, i32
  }
}

module attributes {stable_mosaic.version = 11 : i64} {
  func.func @_conv_relu_max_kernel(%arg0: i32, %arg1: i32, %arg2: memref<16x32xbf16, #tpu.memory_space<vmem>>, %arg3: memref<4x32x32xbf16, #tpu.memory_space<vmem>>, %arg4: memref<1x32xf32, #tpu.memory_space<vmem>>, %arg5: memref<14x32xbf16, #tpu.memory_space<vmem>>, %arg6: memref<2x32xf32, #tpu.memory_space<vmem>>) attributes {dimension_semantics = [#tpu.dimension_semantics<parallel>, #tpu.dimension_semantics<parallel>], iteration_bounds = array<i64: 1, 1>, scalar_prefetch = 0 : i64, scratch_operands = 0 : i64, tpu.core_type = #tpu.core_type<tc>, window_params = [{transform_indices = @transform_0, window_bounds = array<i64: 16, 32>}, {transform_indices = @transform_1, window_bounds = array<i64: 4, 32, 32>}, {transform_indices = @transform_2, window_bounds = array<i64: 1, 32>}, {transform_indices = @transform_3, window_bounds = array<i64: 14, 32>}, {transform_indices = @transform_4, window_bounds = array<i64: 2, 32>}]} {
    %c0 = arith.constant 0 : index
    %c0_0 = arith.constant 0 : index
    %0 = vector.load %arg2[%c0, %c0_0] : memref<16x32xbf16, #tpu.memory_space<vmem>>, vector<13x32xbf16>
    %c0_1 = arith.constant 0 : index
    %c0_2 = arith.constant 0 : index
    %c0_3 = arith.constant 0 : index
    %1 = vector.load %arg3[%c0_1, %c0_2, %c0_3] : memref<4x32x32xbf16, #tpu.memory_space<vmem>>, vector<1x32x32xbf16>
    %2 = vector.shape_cast %1 : vector<1x32x32xbf16> to vector<32x32xbf16>
    %cst = arith.constant dense<0.000000e+00> : vector<13x32xf32>
    %3 = tpu.matmul %0, %2, %cst {dimension_numbers = #tpu.dot_dimension_numbers<[1], [0], [0], [1], [0, 0, 1, 1], [], []>} : vector<13x32xbf16>, vector<32x32xbf16>, vector<13x32xf32> -> vector<13x32xf32>
    %c1 = arith.constant 1 : index
    %c0_4 = arith.constant 0 : index
    %4 = vector.load %arg2[%c1, %c0_4] : memref<16x32xbf16, #tpu.memory_space<vmem>>, vector<13x32xbf16>
    %c1_5 = arith.constant 1 : index
    %c0_6 = arith.constant 0 : index
    %c0_7 = arith.constant 0 : index
    %5 = vector.load %arg3[%c1_5, %c0_6, %c0_7] : memref<4x32x32xbf16, #tpu.memory_space<vmem>>, vector<1x32x32xbf16>
    %6 = vector.shape_cast %5 : vector<1x32x32xbf16> to vector<32x32xbf16>
    %cst_8 = arith.constant dense<0.000000e+00> : vector<13x32xf32>
    %7 = tpu.matmul %4, %6, %cst_8 {dimension_numbers = #tpu.dot_dimension_numbers<[1], [0], [0], [1], [0, 0, 1, 1], [], []>} : vector<13x32xbf16>, vector<32x32xbf16>, vector<13x32xf32> -> vector<13x32xf32>
    %8 = arith.addf %3, %7 : vector<13x32xf32>
    %c2 = arith.constant 2 : index
    %c0_9 = arith.constant 0 : index
    %9 = vector.load %arg2[%c2, %c0_9] : memref<16x32xbf16, #tpu.memory_space<vmem>>, vector<13x32xbf16>
    %c2_10 = arith.constant 2 : index
    %c0_11 = arith.constant 0 : index
    %c0_12 = arith.constant 0 : index
    %10 = vector.load %arg3[%c2_10, %c0_11, %c0_12] : memref<4x32x32xbf16, #tpu.memory_space<vmem>>, vector<1x32x32xbf16>
    %11 = vector.shape_cast %10 : vector<1x32x32xbf16> to vector<32x32xbf16>
    %cst_13 = arith.constant dense<0.000000e+00> : vector<13x32xf32>
    %12 = tpu.matmul %9, %11, %cst_13 {dimension_numbers = #tpu.dot_dimension_numbers<[1], [0], [0], [1], [0, 0, 1, 1], [], []>} : vector<13x32xbf16>, vector<32x32xbf16>, vector<13x32xf32> -> vector<13x32xf32>
    %13 = arith.addf %8, %12 : vector<13x32xf32>
    %c3 = arith.constant 3 : index
    %c0_14 = arith.constant 0 : index
    %14 = vector.load %arg2[%c3, %c0_14] : memref<16x32xbf16, #tpu.memory_space<vmem>>, vector<13x32xbf16>
    %c3_15 = arith.constant 3 : index
    %c0_16 = arith.constant 0 : index
    %c0_17 = arith.constant 0 : index
    %15 = vector.load %arg3[%c3_15, %c0_16, %c0_17] : memref<4x32x32xbf16, #tpu.memory_space<vmem>>, vector<1x32x32xbf16>
    %16 = vector.shape_cast %15 : vector<1x32x32xbf16> to vector<32x32xbf16>
    %cst_18 = arith.constant dense<0.000000e+00> : vector<13x32xf32>
    %17 = tpu.matmul %14, %16, %cst_18 {dimension_numbers = #tpu.dot_dimension_numbers<[1], [0], [0], [1], [0, 0, 1, 1], [], []>} : vector<13x32xbf16>, vector<32x32xbf16>, vector<13x32xf32> -> vector<13x32xf32>
    %18 = arith.addf %13, %17 : vector<13x32xf32>
    %c0_19 = arith.constant 0 : index
    %c0_20 = arith.constant 0 : index
    %19 = vector.load %arg4[%c0_19, %c0_20] : memref<1x32xf32, #tpu.memory_space<vmem>>, vector<1x32xf32>
    %20 = vector.broadcast %19 : vector<1x32xf32> to vector<13x32xf32>
    %21 = arith.addf %18, %20 : vector<13x32xf32>
    %cst_21 = arith.constant 0.000000e+00 : f32
    %22 = vector.broadcast %cst_21 : f32 to vector<13x32xf32>
    %23 = arith.maximumf %21, %22 : vector<13x32xf32>
    %cst_22 = arith.constant 0.000000e+00 : bf16
    %24 = vector.broadcast %cst_22 : bf16 to vector<14x32xbf16>
    %c0_23 = arith.constant 0 : index
    %c0_24 = arith.constant 0 : index
    %25 = vector.load %arg5[%c0_23, %c0_24] : memref<14x32xbf16, #tpu.memory_space<vmem>>, vector<14x32xbf16>
    tpu.vector_store %arg5[%c0_23, %c0_24], %24 {strides = array<i32>} : memref<14x32xbf16, #tpu.memory_space<vmem>>, vector<14x32xbf16>,
    %26 = vector.extract_strided_slice %23 {offsets = [0, 0], sizes = [5, 32], strides = [1, 1]} : vector<13x32xf32> to vector<5x32xf32>
    %cst_25 = arith.constant dense<0xFF800000> : vector<32xf32>
    %27 = vector.multi_reduction <maximumf>, %26, %cst_25 [0] : vector<5x32xf32> to vector<32xf32>
    %28 = vector.shape_cast %27 : vector<32xf32> to vector<1x32xf32>
    %c0_26 = arith.constant 0 : index
    %c0_27 = arith.constant 0 : index
    %29 = vector.load %arg6[%c0_26, %c0_27] : memref<2x32xf32, #tpu.memory_space<vmem>>, vector<1x32xf32>
    tpu.vector_store %arg6[%c0_26, %c0_27], %28 {strides = array<i32>} : memref<2x32xf32, #tpu.memory_space<vmem>>, vector<1x32xf32>,
    %30 = arith.truncf %26 : vector<5x32xf32> to vector<5x32xbf16>
    %c1_28 = arith.constant 1 : index
    %c0_29 = arith.constant 0 : index
    %31 = vector.load %arg5[%c1_28, %c0_29] : memref<14x32xbf16, #tpu.memory_space<vmem>>, vector<5x32xbf16>
    tpu.vector_store %arg5[%c1_28, %c0_29], %30 {strides = array<i32>} : memref<14x32xbf16, #tpu.memory_space<vmem>>, vector<5x32xbf16>,
    %32 = vector.extract_strided_slice %23 {offsets = [8, 0], sizes = [5, 32], strides = [1, 1]} : vector<13x32xf32> to vector<5x32xf32>
    %cst_30 = arith.constant dense<0xFF800000> : vector<32xf32>
    %33 = vector.multi_reduction <maximumf>, %32, %cst_30 [0] : vector<5x32xf32> to vector<32xf32>
    %34 = vector.shape_cast %33 : vector<32xf32> to vector<1x32xf32>
    %c1_31 = arith.constant 1 : index
    %c0_32 = arith.constant 0 : index
    %35 = vector.load %arg6[%c1_31, %c0_32] : memref<2x32xf32, #tpu.memory_space<vmem>>, vector<1x32xf32>
    tpu.vector_store %arg6[%c1_31, %c0_32], %34 {strides = array<i32>} : memref<2x32xf32, #tpu.memory_space<vmem>>, vector<1x32xf32>,
    %36 = arith.truncf %32 : vector<5x32xf32> to vector<5x32xbf16>
    %c8 = arith.constant 8 : index
    %c0_33 = arith.constant 0 : index
    %37 = vector.load %arg5[%c8, %c0_33] : memref<14x32xbf16, #tpu.memory_space<vmem>>, vector<5x32xbf16>
    tpu.vector_store %arg5[%c8, %c0_33], %36 {strides = array<i32>} : memref<14x32xbf16, #tpu.memory_space<vmem>>, vector<5x32xbf16>,
    return
  }
  func.func @transform_0(%arg0: i32, %arg1: i32) -> (i32, i32) {
    %c0_i32 = arith.constant 0 : i32
    %c0_i32_0 = arith.constant 0 : i32
    return %arg1, %c0_i32 : i32, i32
  }
  func.func @transform_1(%arg0: i32, %arg1: i32) -> (i32, i32, i32) {
    %c0_i32 = arith.constant 0 : i32
    %c0_i32_0 = arith.constant 0 : i32
    %c0_i32_1 = arith.constant 0 : i32
    return %c0_i32, %c0_i32_0, %arg0 : i32, i32, i32
  }
  func.func @transform_2(%arg0: i32, %arg1: i32) -> (i32, i32) {
    %c0_i32 = arith.constant 0 : i32
    %c0_i32_0 = arith.constant 0 : i32
    return %c0_i32, %arg0 : i32, i32
  }
  func.func @transform_3(%arg0: i32, %arg1: i32) -> (i32, i32) {
    %c0_i32 = arith.constant 0 : i32
    return %arg1, %arg0 : i32, i32
  }
  func.func @transform_4(%arg0: i32, %arg1: i32) -> (i32, i32) {
    %c0_i32 = arith.constant 0 : i32
    return %arg1, %arg0 : i32, i32
  }
}

module attributes {stable_mosaic.version = 11 : i64} {
  func.func @_conv_relu_max_kernel(%arg0: i32, %arg1: i32, %arg2: memref<18x32xbf16, #tpu.memory_space<vmem>>, %arg3: memref<4x32x32xbf16, #tpu.memory_space<vmem>>, %arg4: memref<1x32xf32, #tpu.memory_space<vmem>>, %arg5: memref<16x32xbf16, #tpu.memory_space<vmem>>, %arg6: memref<2x32xf32, #tpu.memory_space<vmem>>) attributes {dimension_semantics = [#tpu.dimension_semantics<parallel>, #tpu.dimension_semantics<parallel>], iteration_bounds = array<i64: 1, 1>, scalar_prefetch = 0 : i64, scratch_operands = 0 : i64, tpu.core_type = #tpu.core_type<tc>, window_params = [{transform_indices = @transform_0, window_bounds = array<i64: 18, 32>}, {transform_indices = @transform_1, window_bounds = array<i64: 4, 32, 32>}, {transform_indices = @transform_2, window_bounds = array<i64: 1, 32>}, {transform_indices = @transform_3, window_bounds = array<i64: 16, 32>}, {transform_indices = @transform_4, window_bounds = array<i64: 2, 32>}]} {
    %c0 = arith.constant 0 : index
    %c0_0 = arith.constant 0 : index
    %0 = vector.load %arg2[%c0, %c0_0] : memref<18x32xbf16, #tpu.memory_space<vmem>>, vector<15x32xbf16>
    %c0_1 = arith.constant 0 : index
    %c0_2 = arith.constant 0 : index
    %c0_3 = arith.constant 0 : index
    %1 = vector.load %arg3[%c0_1, %c0_2, %c0_3] : memref<4x32x32xbf16, #tpu.memory_space<vmem>>, vector<1x32x32xbf16>
    %2 = vector.shape_cast %1 : vector<1x32x32xbf16> to vector<32x32xbf16>
    %cst = arith.constant dense<0.000000e+00> : vector<15x32xf32>
    %3 = tpu.matmul %0, %2, %cst {dimension_numbers = #tpu.dot_dimension_numbers<[1], [0], [0], [1], [0, 0, 1, 1], [], []>} : vector<15x32xbf16>, vector<32x32xbf16>, vector<15x32xf32> -> vector<15x32xf32>
    %c1 = arith.constant 1 : index
    %c0_4 = arith.constant 0 : index
    %4 = vector.load %arg2[%c1, %c0_4] : memref<18x32xbf16, #tpu.memory_space<vmem>>, vector<15x32xbf16>
    %c1_5 = arith.constant 1 : index
    %c0_6 = arith.constant 0 : index
    %c0_7 = arith.constant 0 : index
    %5 = vector.load %arg3[%c1_5, %c0_6, %c0_7] : memref<4x32x32xbf16, #tpu.memory_space<vmem>>, vector<1x32x32xbf16>
    %6 = vector.shape_cast %5 : vector<1x32x32xbf16> to vector<32x32xbf16>
    %cst_8 = arith.constant dense<0.000000e+00> : vector<15x32xf32>
    %7 = tpu.matmul %4, %6, %cst_8 {dimension_numbers = #tpu.dot_dimension_numbers<[1], [0], [0], [1], [0, 0, 1, 1], [], []>} : vector<15x32xbf16>, vector<32x32xbf16>, vector<15x32xf32> -> vector<15x32xf32>
    %8 = arith.addf %3, %7 : vector<15x32xf32>
    %c2 = arith.constant 2 : index
    %c0_9 = arith.constant 0 : index
    %9 = vector.load %arg2[%c2, %c0_9] : memref<18x32xbf16, #tpu.memory_space<vmem>>, vector<15x32xbf16>
    %c2_10 = arith.constant 2 : index
    %c0_11 = arith.constant 0 : index
    %c0_12 = arith.constant 0 : index
    %10 = vector.load %arg3[%c2_10, %c0_11, %c0_12] : memref<4x32x32xbf16, #tpu.memory_space<vmem>>, vector<1x32x32xbf16>
    %11 = vector.shape_cast %10 : vector<1x32x32xbf16> to vector<32x32xbf16>
    %cst_13 = arith.constant dense<0.000000e+00> : vector<15x32xf32>
    %12 = tpu.matmul %9, %11, %cst_13 {dimension_numbers = #tpu.dot_dimension_numbers<[1], [0], [0], [1], [0, 0, 1, 1], [], []>} : vector<15x32xbf16>, vector<32x32xbf16>, vector<15x32xf32> -> vector<15x32xf32>
    %13 = arith.addf %8, %12 : vector<15x32xf32>
    %c3 = arith.constant 3 : index
    %c0_14 = arith.constant 0 : index
    %14 = vector.load %arg2[%c3, %c0_14] : memref<18x32xbf16, #tpu.memory_space<vmem>>, vector<15x32xbf16>
    %c3_15 = arith.constant 3 : index
    %c0_16 = arith.constant 0 : index
    %c0_17 = arith.constant 0 : index
    %15 = vector.load %arg3[%c3_15, %c0_16, %c0_17] : memref<4x32x32xbf16, #tpu.memory_space<vmem>>, vector<1x32x32xbf16>
    %16 = vector.shape_cast %15 : vector<1x32x32xbf16> to vector<32x32xbf16>
    %cst_18 = arith.constant dense<0.000000e+00> : vector<15x32xf32>
    %17 = tpu.matmul %14, %16, %cst_18 {dimension_numbers = #tpu.dot_dimension_numbers<[1], [0], [0], [1], [0, 0, 1, 1], [], []>} : vector<15x32xbf16>, vector<32x32xbf16>, vector<15x32xf32> -> vector<15x32xf32>
    %18 = arith.addf %13, %17 : vector<15x32xf32>
    %c0_19 = arith.constant 0 : index
    %c0_20 = arith.constant 0 : index
    %19 = vector.load %arg4[%c0_19, %c0_20] : memref<1x32xf32, #tpu.memory_space<vmem>>, vector<1x32xf32>
    %20 = vector.broadcast %19 : vector<1x32xf32> to vector<15x32xf32>
    %21 = arith.addf %18, %20 : vector<15x32xf32>
    %cst_21 = arith.constant 0.000000e+00 : f32
    %22 = vector.broadcast %cst_21 : f32 to vector<15x32xf32>
    %23 = arith.maximumf %21, %22 : vector<15x32xf32>
    %cst_22 = arith.constant 0.000000e+00 : bf16
    %24 = vector.broadcast %cst_22 : bf16 to vector<16x32xbf16>
    %c0_23 = arith.constant 0 : index
    %c0_24 = arith.constant 0 : index
    %25 = vector.load %arg5[%c0_23, %c0_24] : memref<16x32xbf16, #tpu.memory_space<vmem>>, vector<16x32xbf16>
    tpu.vector_store %arg5[%c0_23, %c0_24], %24 {strides = array<i32>} : memref<16x32xbf16, #tpu.memory_space<vmem>>, vector<16x32xbf16>,
    %26 = vector.extract_strided_slice %23 {offsets = [0, 0], sizes = [6, 32], strides = [1, 1]} : vector<15x32xf32> to vector<6x32xf32>
    %cst_25 = arith.constant dense<0xFF800000> : vector<32xf32>
    %27 = vector.multi_reduction <maximumf>, %26, %cst_25 [0] : vector<6x32xf32> to vector<32xf32>
    %28 = vector.shape_cast %27 : vector<32xf32> to vector<1x32xf32>
    %c0_26 = arith.constant 0 : index
    %c0_27 = arith.constant 0 : index
    %29 = vector.load %arg6[%c0_26, %c0_27] : memref<2x32xf32, #tpu.memory_space<vmem>>, vector<1x32xf32>
    tpu.vector_store %arg6[%c0_26, %c0_27], %28 {strides = array<i32>} : memref<2x32xf32, #tpu.memory_space<vmem>>, vector<1x32xf32>,
    %30 = arith.truncf %26 : vector<6x32xf32> to vector<6x32xbf16>
    %c1_28 = arith.constant 1 : index
    %c0_29 = arith.constant 0 : index
    %31 = vector.load %arg5[%c1_28, %c0_29] : memref<16x32xbf16, #tpu.memory_space<vmem>>, vector<6x32xbf16>
    tpu.vector_store %arg5[%c1_28, %c0_29], %30 {strides = array<i32>} : memref<16x32xbf16, #tpu.memory_space<vmem>>, vector<6x32xbf16>,
    %32 = vector.extract_strided_slice %23 {offsets = [9, 0], sizes = [6, 32], strides = [1, 1]} : vector<15x32xf32> to vector<6x32xf32>
    %cst_30 = arith.constant dense<0xFF800000> : vector<32xf32>
    %33 = vector.multi_reduction <maximumf>, %32, %cst_30 [0] : vector<6x32xf32> to vector<32xf32>
    %34 = vector.shape_cast %33 : vector<32xf32> to vector<1x32xf32>
    %c1_31 = arith.constant 1 : index
    %c0_32 = arith.constant 0 : index
    %35 = vector.load %arg6[%c1_31, %c0_32] : memref<2x32xf32, #tpu.memory_space<vmem>>, vector<1x32xf32>
    tpu.vector_store %arg6[%c1_31, %c0_32], %34 {strides = array<i32>} : memref<2x32xf32, #tpu.memory_space<vmem>>, vector<1x32xf32>,
    %36 = arith.truncf %32 : vector<6x32xf32> to vector<6x32xbf16>
    %c9 = arith.constant 9 : index
    %c0_33 = arith.constant 0 : index
    %37 = vector.load %arg5[%c9, %c0_33] : memref<16x32xbf16, #tpu.memory_space<vmem>>, vector<6x32xbf16>
    tpu.vector_store %arg5[%c9, %c0_33], %36 {strides = array<i32>} : memref<16x32xbf16, #tpu.memory_space<vmem>>, vector<6x32xbf16>,
    return
  }
  func.func @transform_0(%arg0: i32, %arg1: i32) -> (i32, i32) {
    %c0_i32 = arith.constant 0 : i32
    %c0_i32_0 = arith.constant 0 : i32
    return %arg1, %c0_i32 : i32, i32
  }
  func.func @transform_1(%arg0: i32, %arg1: i32) -> (i32, i32, i32) {
    %c0_i32 = arith.constant 0 : i32
    %c0_i32_0 = arith.constant 0 : i32
    %c0_i32_1 = arith.constant 0 : i32
    return %c0_i32, %c0_i32_0, %arg0 : i32, i32, i32
  }
  func.func @transform_2(%arg0: i32, %arg1: i32) -> (i32, i32) {
    %c0_i32 = arith.constant 0 : i32
    %c0_i32_0 = arith.constant 0 : i32
    return %c0_i32, %arg0 : i32, i32
  }
  func.func @transform_3(%arg0: i32, %arg1: i32) -> (i32, i32) {
    %c0_i32 = arith.constant 0 : i32
    return %arg1, %arg0 : i32, i32
  }
  func.func @transform_4(%arg0: i32, %arg1: i32) -> (i32, i32) {
    %c0_i32 = arith.constant 0 : i32
    return %arg1, %arg0 : i32, i32
  }
}

module attributes {stable_mosaic.version = 11 : i64} {
  func.func @_conv_relu_max_kernel(%arg0: i32, %arg1: i32, %arg2: memref<14x32xbf16, #tpu.memory_space<vmem>>, %arg3: memref<4x32x32xbf16, #tpu.memory_space<vmem>>, %arg4: memref<1x32xf32, #tpu.memory_space<vmem>>, %arg5: memref<12x32xbf16, #tpu.memory_space<vmem>>, %arg6: memref<2x32xf32, #tpu.memory_space<vmem>>) attributes {dimension_semantics = [#tpu.dimension_semantics<parallel>, #tpu.dimension_semantics<parallel>], iteration_bounds = array<i64: 1, 1>, scalar_prefetch = 0 : i64, scratch_operands = 0 : i64, tpu.core_type = #tpu.core_type<tc>, window_params = [{transform_indices = @transform_0, window_bounds = array<i64: 14, 32>}, {transform_indices = @transform_1, window_bounds = array<i64: 4, 32, 32>}, {transform_indices = @transform_2, window_bounds = array<i64: 1, 32>}, {transform_indices = @transform_3, window_bounds = array<i64: 12, 32>}, {transform_indices = @transform_4, window_bounds = array<i64: 2, 32>}]} {
    %c0 = arith.constant 0 : index
    %c0_0 = arith.constant 0 : index
    %0 = vector.load %arg2[%c0, %c0_0] : memref<14x32xbf16, #tpu.memory_space<vmem>>, vector<11x32xbf16>
    %c0_1 = arith.constant 0 : index
    %c0_2 = arith.constant 0 : index
    %c0_3 = arith.constant 0 : index
    %1 = vector.load %arg3[%c0_1, %c0_2, %c0_3] : memref<4x32x32xbf16, #tpu.memory_space<vmem>>, vector<1x32x32xbf16>
    %2 = vector.shape_cast %1 : vector<1x32x32xbf16> to vector<32x32xbf16>
    %cst = arith.constant dense<0.000000e+00> : vector<11x32xf32>
    %3 = tpu.matmul %0, %2, %cst {dimension_numbers = #tpu.dot_dimension_numbers<[1], [0], [0], [1], [0, 0, 1, 1], [], []>} : vector<11x32xbf16>, vector<32x32xbf16>, vector<11x32xf32> -> vector<11x32xf32>
    %c1 = arith.constant 1 : index
    %c0_4 = arith.constant 0 : index
    %4 = vector.load %arg2[%c1, %c0_4] : memref<14x32xbf16, #tpu.memory_space<vmem>>, vector<11x32xbf16>
    %c1_5 = arith.constant 1 : index
    %c0_6 = arith.constant 0 : index
    %c0_7 = arith.constant 0 : index
    %5 = vector.load %arg3[%c1_5, %c0_6, %c0_7] : memref<4x32x32xbf16, #tpu.memory_space<vmem>>, vector<1x32x32xbf16>
    %6 = vector.shape_cast %5 : vector<1x32x32xbf16> to vector<32x32xbf16>
    %cst_8 = arith.constant dense<0.000000e+00> : vector<11x32xf32>
    %7 = tpu.matmul %4, %6, %cst_8 {dimension_numbers = #tpu.dot_dimension_numbers<[1], [0], [0], [1], [0, 0, 1, 1], [], []>} : vector<11x32xbf16>, vector<32x32xbf16>, vector<11x32xf32> -> vector<11x32xf32>
    %8 = arith.addf %3, %7 : vector<11x32xf32>
    %c2 = arith.constant 2 : index
    %c0_9 = arith.constant 0 : index
    %9 = vector.load %arg2[%c2, %c0_9] : memref<14x32xbf16, #tpu.memory_space<vmem>>, vector<11x32xbf16>
    %c2_10 = arith.constant 2 : index
    %c0_11 = arith.constant 0 : index
    %c0_12 = arith.constant 0 : index
    %10 = vector.load %arg3[%c2_10, %c0_11, %c0_12] : memref<4x32x32xbf16, #tpu.memory_space<vmem>>, vector<1x32x32xbf16>
    %11 = vector.shape_cast %10 : vector<1x32x32xbf16> to vector<32x32xbf16>
    %cst_13 = arith.constant dense<0.000000e+00> : vector<11x32xf32>
    %12 = tpu.matmul %9, %11, %cst_13 {dimension_numbers = #tpu.dot_dimension_numbers<[1], [0], [0], [1], [0, 0, 1, 1], [], []>} : vector<11x32xbf16>, vector<32x32xbf16>, vector<11x32xf32> -> vector<11x32xf32>
    %13 = arith.addf %8, %12 : vector<11x32xf32>
    %c3 = arith.constant 3 : index
    %c0_14 = arith.constant 0 : index
    %14 = vector.load %arg2[%c3, %c0_14] : memref<14x32xbf16, #tpu.memory_space<vmem>>, vector<11x32xbf16>
    %c3_15 = arith.constant 3 : index
    %c0_16 = arith.constant 0 : index
    %c0_17 = arith.constant 0 : index
    %15 = vector.load %arg3[%c3_15, %c0_16, %c0_17] : memref<4x32x32xbf16, #tpu.memory_space<vmem>>, vector<1x32x32xbf16>
    %16 = vector.shape_cast %15 : vector<1x32x32xbf16> to vector<32x32xbf16>
    %cst_18 = arith.constant dense<0.000000e+00> : vector<11x32xf32>
    %17 = tpu.matmul %14, %16, %cst_18 {dimension_numbers = #tpu.dot_dimension_numbers<[1], [0], [0], [1], [0, 0, 1, 1], [], []>} : vector<11x32xbf16>, vector<32x32xbf16>, vector<11x32xf32> -> vector<11x32xf32>
    %18 = arith.addf %13, %17 : vector<11x32xf32>
    %c0_19 = arith.constant 0 : index
    %c0_20 = arith.constant 0 : index
    %19 = vector.load %arg4[%c0_19, %c0_20] : memref<1x32xf32, #tpu.memory_space<vmem>>, vector<1x32xf32>
    %20 = vector.broadcast %19 : vector<1x32xf32> to vector<11x32xf32>
    %21 = arith.addf %18, %20 : vector<11x32xf32>
    %cst_21 = arith.constant 0.000000e+00 : f32
    %22 = vector.broadcast %cst_21 : f32 to vector<11x32xf32>
    %23 = arith.maximumf %21, %22 : vector<11x32xf32>
    %cst_22 = arith.constant 0.000000e+00 : bf16
    %24 = vector.broadcast %cst_22 : bf16 to vector<12x32xbf16>
    %c0_23 = arith.constant 0 : index
    %c0_24 = arith.constant 0 : index
    %25 = vector.load %arg5[%c0_23, %c0_24] : memref<12x32xbf16, #tpu.memory_space<vmem>>, vector<12x32xbf16>
    tpu.vector_store %arg5[%c0_23, %c0_24], %24 {strides = array<i32>} : memref<12x32xbf16, #tpu.memory_space<vmem>>, vector<12x32xbf16>,
    %26 = vector.extract_strided_slice %23 {offsets = [0, 0], sizes = [4, 32], strides = [1, 1]} : vector<11x32xf32> to vector<4x32xf32>
    %cst_25 = arith.constant dense<0xFF800000> : vector<32xf32>
    %27 = vector.multi_reduction <maximumf>, %26, %cst_25 [0] : vector<4x32xf32> to vector<32xf32>
    %28 = vector.shape_cast %27 : vector<32xf32> to vector<1x32xf32>
    %c0_26 = arith.constant 0 : index
    %c0_27 = arith.constant 0 : index
    %29 = vector.load %arg6[%c0_26, %c0_27] : memref<2x32xf32, #tpu.memory_space<vmem>>, vector<1x32xf32>
    tpu.vector_store %arg6[%c0_26, %c0_27], %28 {strides = array<i32>} : memref<2x32xf32, #tpu.memory_space<vmem>>, vector<1x32xf32>,
    %30 = arith.truncf %26 : vector<4x32xf32> to vector<4x32xbf16>
    %c1_28 = arith.constant 1 : index
    %c0_29 = arith.constant 0 : index
    %31 = vector.load %arg5[%c1_28, %c0_29] : memref<12x32xbf16, #tpu.memory_space<vmem>>, vector<4x32xbf16>
    tpu.vector_store %arg5[%c1_28, %c0_29], %30 {strides = array<i32>} : memref<12x32xbf16, #tpu.memory_space<vmem>>, vector<4x32xbf16>,
    %32 = vector.extract_strided_slice %23 {offsets = [7, 0], sizes = [4, 32], strides = [1, 1]} : vector<11x32xf32> to vector<4x32xf32>
    %cst_30 = arith.constant dense<0xFF800000> : vector<32xf32>
    %33 = vector.multi_reduction <maximumf>, %32, %cst_30 [0] : vector<4x32xf32> to vector<32xf32>
    %34 = vector.shape_cast %33 : vector<32xf32> to vector<1x32xf32>
    %c1_31 = arith.constant 1 : index
    %c0_32 = arith.constant 0 : index
    %35 = vector.load %arg6[%c1_31, %c0_32] : memref<2x32xf32, #tpu.memory_space<vmem>>, vector<1x32xf32>
    tpu.vector_store %arg6[%c1_31, %c0_32], %34 {strides = array<i32>} : memref<2x32xf32, #tpu.memory_space<vmem>>, vector<1x32xf32>,
    %36 = arith.truncf %32 : vector<4x32xf32> to vector<4x32xbf16>
    %c7 = arith.constant 7 : index
    %c0_33 = arith.constant 0 : index
    %37 = vector.load %arg5[%c7, %c0_33] : memref<12x32xbf16, #tpu.memory_space<vmem>>, vector<4x32xbf16>
    tpu.vector_store %arg5[%c7, %c0_33], %36 {strides = array<i32>} : memref<12x32xbf16, #tpu.memory_space<vmem>>, vector<4x32xbf16>,
    return
  }
  func.func @transform_0(%arg0: i32, %arg1: i32) -> (i32, i32) {
    %c0_i32 = arith.constant 0 : i32
    %c0_i32_0 = arith.constant 0 : i32
    return %arg1, %c0_i32 : i32, i32
  }
  func.func @transform_1(%arg0: i32, %arg1: i32) -> (i32, i32, i32) {
    %c0_i32 = arith.constant 0 : i32
    %c0_i32_0 = arith.constant 0 : i32
    %c0_i32_1 = arith.constant 0 : i32
    return %c0_i32, %c0_i32_0, %arg0 : i32, i32, i32
  }
  func.func @transform_2(%arg0: i32, %arg1: i32) -> (i32, i32) {
    %c0_i32 = arith.constant 0 : i32
    %c0_i32_0 = arith.constant 0 : i32
    return %c0_i32, %arg0 : i32, i32
  }
  func.func @transform_3(%arg0: i32, %arg1: i32) -> (i32, i32) {
    %c0_i32 = arith.constant 0 : i32
    return %arg1, %arg0 : i32, i32
  }
  func.func @transform_4(%arg0: i32, %arg1: i32) -> (i32, i32) {
    %c0_i32 = arith.constant 0 : i32
    return %arg1, %arg0 : i32, i32
  }
}

</mosaic_0001>

<bundles_post_ra>
// kernel: convnet_encoder2_forward.6
= control target key start
LH: loop header
LB: loop body
LE: loop exit
PB: predicated region body
PF: predicated region fallthrough
CT: control target
= control target key end

     0   :  { %vm52_vm0 = vcmask 261120   ;;  %vm194_vm1 = vcmask 257024   ;;  %vm196_vm2 = vcmask 256000   ;;  %v313_v24 = vmov 0   ;;  %s411_s1 = inlined_call_operand.vmem [shape: bf16[4,32,32], index: 1, kind: input, shape index: {}]   ;;  %s412_s0 = inlined_call_operand.vmem [shape: bf16[16,32], index: 0, kind: input, shape index: {}]   ;;  %s413_s2 = inlined_call_operand.vmem [shape: f32[1,32], index: 2, kind: input, shape index: {}]   ;;  %s414_s3 = inlined_call_operand.vmem [shape: bf16[14,32], index: 3, kind: output, shape index: {0}]   ;;  %s415_s4 = inlined_call_operand.vmem [shape: f32[2,32], index: 4, kind: output, shape index: {1}]  }
   0x1   :  { %v305_v0 = vld [vmem:[%s411_s1 + $0x18] sm:$0xff]  ;;  %v303_v1 = vld [vmem:[%s411_s1 + $0x8] sm:$0xff]  ;;  %v304_v4 = vld [vmem:[%s411_s1 + $0x10] sm:$0xff]  ;;  %195 = vst.msk [vmem:[%s414_s3] sm:$0xf] %vm194_vm1, %v313_v24  ;;  %vm198_vm3 = vcmask 258048  }
   0x2   :  { %v308_v2 = vld [vmem:[%s411_s1 + $0x28] sm:$0xff]  ;;  %v310_v3 = vld [vmem:[%s411_s1 + $0x38] sm:$0xff]  ;;  %v302_v5 = vld [vmem:[%s411_s1] sm:$0xff]  ;;  %62 = vmatpush.bf16.msra.mxu0 %v305_v0  ;;  %90 = vmatpush.bf16.msra.mxu1 %v303_v1  ;;  %197 = vst.msk [vmem:[%s414_s3 + $0x4] sm:$0x7] %vm196_vm2, %v313_v24  ;;  %vm206_vm8 = vcmask 253952  }
   0x3   :  { %v307_v6 = vld [vmem:[%s411_s1 + $0x20] sm:$0xff]  ;;  %v309_v7 = vld [vmem:[%s411_s1 + $0x30] sm:$0xff]  ;;  %132 = vmatpush.bf16.msra.mxu2 %v308_v2  ;;  %176 = vmatpush.bf16.msra.mxu3 %v310_v3  ;;  %vm218_vm4 = vsmask.f32 7938  ;;  %vm232_vm5 = vsmask.f32 2304 }
   0x4   :  { %v251_v8 = vld [vmem:[%s412_s0] sm:$0xf]  ;;  %v301_v9 = vld [vmem:[%s412_s0] sm:$0x70]  ;;  %vm219_vm6 = vmand %vm196_vm2, %vm218_vm4 }
   0x5   :  { %v277_v10 = vld [vmem:[%s412_s0] sm:$0xe]  ;;  %v306_v11 = vld [vmem:[%s412_s0] sm:$0xf0]  ;;  %v252_v12 = vor.u32 %v301_v9, %v251_v8  ;;  %v312_v30 = vld [vmem:[%s413_s2] ss:$0 sm:$0xff] }
   0x6   :  { %v278_v13 = vor.u32 %v306_v11, %v277_v10  ;;  %63 = vmatpush.bf16.msra.mxu0 %v304_v4  ;;  %91 = vmatpush.bf16.msra.mxu1 %v302_v5  ;;  %vm233_vm7 = vmand %vm196_vm2, %vm232_vm5 }
   0x7   :  { %v34_v14 = vshrl.u32 %v252_v12, 16  ;;  %v36_v15 = vshll.u32 %v252_v12, 16  ;;  %133 = vmatpush.bf16.msra.mxu2 %v307_v6  ;;  %177 = vmatpush.bf16.msra.mxu3 %v309_v7 }
   0x8   :  { %v110_v16 = vrot.slane %v278_v13, 1  ;;  %v148_v17 = vshrl.u32 %v278_v13, 16  ;;  %v151_v18 = vshll.u32 %v278_v13, 16  ;;  %v220_v51 = vld [vmem:[%s414_s3] sm:$0x7] }
   0x9   :  { %v38_v19 = vrot.slane %v36_v15, 1  ;;  %270 = vmatmul.msk.bf16.vlgmr.msra.gmra.mxu1 %vm52_vm0, %v252_v12  ;;  %v234_v55 = vld [vmem:[%s414_s3 + $0x4] sm:$0x7] }
   0xa   :  { %v150_v20 = vrot.slane %v148_v17, 1  ;;  %v153_v21 = vrot.slane %v151_v18, 2  ;;  %287 = vmatmul.msk.bf16.vlgmr.msra.gmra.mxu2 %vm52_vm0, %v110_v16 }
   0xb   :  { %v39_v22 = vor.u32 %v38_v19, %v34_v14 }
   0xc   :  { %v154_v23 = vor.u32 %v153_v21, %v150_v20 }
   0xd   :  { %261 = vmatmul.msk.bf16.vlgmr.msra.gmra.mxu0 %vm52_vm0, %v39_v22 }
   0xe   :  { %300 = vmatmul.msk.bf16.vlgmr.msra.gmra.mxu3 %vm52_vm0, %v154_v23 }
  0x86   :  { %v93_v25 = vpop.f32.mrf.mxu1 }
  0x8a   :  { %v65_v26 = vpop.f32.mrf.mxu0 }
  0x8b   :  { %v94_v27 = vadd.f32 %v93_v25, %v65_v26 }
  0x8d   :  { %v135_v28 = vpop.f32.mrf.mxu2 }
  0x8e   :  { %v140_v29 = vadd.f32 %v135_v28, %v94_v27  ;;  %v95_v34 = vpop.f32.mrf.mxu1 }
  0x91   :  { %v179_v31 = vpop.f32.mrf.mxu3 }
  0x92   :  { %v184_v32 = vadd.f32 %v179_v31, %v140_v29  ;;  %v67_v33 = vpop.f32.mrf.mxu0 }
  0x93   :  { %v96_v36 = vadd.f32 %v95_v34, %v67_v33 }
  0x94   :  { %v190_v35 = vadd.f32 %v312_v30, %v184_v32 }
  0x95   :  { %v137_v38 = vpop.f32.mrf.mxu2 }
  0x96   :  { %v192_v37 = vmax.f32 %v190_v35, 0.0  ;;  %v141_v39 = vadd.f32 %v137_v38, %v96_v36 }
  0x98   :  { %v199_v40 = vsel %vm198_vm3, %v192_v37, -inf  ;;  %v208_v41 = vpack.c.bf16 %v192_v37, %v192_v37 }
  0x99   :  { %v200_v42 = vrot.slane %v199_v40, 4  ;;  %v181_v43 = vpop.f32.mrf.mxu3 }
  0x9a   :  { %v210_v44 = vshrl.u32 %v208_v41, 16  ;;  %v185_v45 = vadd.f32 %v181_v43, %v141_v39  ;;  %v213_v48 = vshll.u32 %v208_v41, 16 }
  0x9b   :  { %v201_v46 = vmax.f32 %v199_v40, %v200_v42 }
  0x9c   :  { %v212_v47 = vrot.slane %v210_v44, 7  ;;  %v191_v49 = vadd.f32 %v312_v30, %v185_v45 }
  0x9d   :  { %v202_v50 = vrot.slane %v201_v46, 2 }
  0x9e   :  { %v215_v52 = vor.u32 %v213_v48, %v212_v47  ;;  %v193_v53 = vmax.f32 %v191_v49, 0.0 }
  0x9f   :  { %v203_v54 = vmax.f32 %v201_v46, %v202_v50 }
  0xa0   :  { %v221_v56 = vsel %vm219_vm6, %v215_v52, %v220_v51  ;;  %v223_v57 = vsel %vm198_vm3, %v193_v53, -inf  ;;  %v231_v58 = vpack.c.bf16 %v193_v53, %v193_v53 }
  0xa1   :  { %v204_v59 = vrot.slane %v203_v54, 1  ;;  %222 = vst [vmem:[%s414_s3] sm:$0x7] %v221_v56  ;;  %v224_v60 = vrot.slane %v223_v57, 4 }
  0xa2   :  { %v235_v61 = vsel %vm233_vm7, %v231_v58, %v234_v55 }
  0xa3   :  { %v205_v62 = vmax.f32 %v203_v54, %v204_v59  ;;  %v225_v63 = vmax.f32 %v223_v57, %v224_v60  ;;  %236 = vst [vmem:[%s414_s3 + $0x4] sm:$0x7] %v235_v61 }
  0xa5   :  { %207 = vst.msk [vmem:[%s415_s4] sm:$0x1] %vm206_vm8, %v205_v62  ;;  %v226_v0 = vrot.slane %v225_v63, 2 }
  0xa7   :  { %v227_v1 = vmax.f32 %v225_v63, %v226_v0 }
  0xa9   :  { %v228_v2 = vrot.slane %v227_v1, 1 }
  0xab   :  { %v229_v3 = vmax.f32 %v227_v1, %v228_v2 }
  0xad   :  { %230 = vst.msk [vmem:[%s415_s4 + $0x1] sm:$0x1] %vm206_vm8, %v229_v3 }

// kernel: convnet_encoder2_forward.4
= control target key start
LH: loop header
LB: loop body
LE: loop exit
PB: predicated region body
PF: predicated region fallthrough
CT: control target
= control target key end

     0   :  { %vm64_vm0 = vcmask 261120   ;;  %vm37_vm1 = vsmask.f32 7424  ;;  %vm136_vm2 = vcmask 1046528   ;;  %vm184_vm3 = vsmask.f32 6400  ;;  %s493_s1 = inlined_call_operand.vmem [shape: bf16[4,32,32], index: 1, kind: input, shape index: {}]   ;;  %s494_s0 = inlined_call_operand.vmem [shape: bf16[20,32], index: 0, kind: input, shape index: {}]   ;;  %s495_s2 = inlined_call_operand.vmem [shape: f32[1,32], index: 2, kind: input, shape index: {}]   ;;  %s496_s3 = inlined_call_operand.vmem [shape: bf16[18,32], index: 3, kind: output, shape index: {0}]   ;;  %s497_s4 = inlined_call_operand.vmem [shape: f32[2,32], index: 4, kind: output, shape index: {1}]  }
   0x1   :  { %v364_v0 = vld [vmem:[%s493_s1 + $0x18] sm:$0xff]  ;;  %v362_v1 = vld [vmem:[%s493_s1 + $0x8] sm:$0xff]  ;;  %v363_v4 = vld [vmem:[%s493_s1 + $0x10] sm:$0xff]  ;;  %vm251_vm4 = vcmask 257024   ;;  %v378_v40 = vmov 0   ;;  %vm254_vm5 = vcmask 253952  }
   0x2   :  { %v366_v2 = vld [vmem:[%s493_s1 + $0x28] sm:$0xff]  ;;  %v368_v3 = vld [vmem:[%s493_s1 + $0x38] sm:$0xff]  ;;  %77 = vmatpush.bf16.msra.mxu0 %v364_v0  ;;  %111 = vmatpush.bf16.msra.mxu1 %v362_v1  ;;  %v361_v5 = vld [vmem:[%s493_s1] sm:$0xff]  ;;  %252 = vst.msk [vmem:[%s496_s3] sm:$0xf] %vm251_vm4, %v378_v40  ;;  %vm256_vm6 = vcmask 260096  }
   0x3   :  { %v365_v6 = vld [vmem:[%s493_s1 + $0x20] sm:$0xff]  ;;  %164 = vmatpush.bf16.msra.mxu2 %v366_v2  ;;  %226 = vmatpush.bf16.msra.mxu3 %v368_v3  ;;  %v367_v8 = vld [vmem:[%s493_s1 + $0x30] sm:$0xff]  ;;  %v19_v9 = vld [vmem:[%s494_s0 + $0x8] sm:$0x1]  ;;  %253 = vst.msk [vmem:[%s496_s3 + $0x4] sm:$0xf] %vm251_vm4, %v378_v40 }
   0x4   :  { %v370_v7 = vld [vmem:[%s494_s0] sm:$0xff]   ;;  %v34_v12 = vunpack.c.l.b16 %v19_v9  ;;  %v124_v15 = vld [vmem:[%s494_s0 + $0x8] sm:$0x3]  ;;  %255 = vst.msk [vmem:[%s496_s3 + $0x8] sm:$0x1] %vm254_vm5, %v378_v40  ;;  %vm293_vm9 = vcmask 257025  }
   0x5   :  { %v41_v10 = vshll.u32 %v370_v7, 16  ;;  %v373_v11 = vld [vmem:[%s494_s0] sm:$0xf0]  ;;  %v39_v13 = vshrl.u32 %v370_v7, 16  ;;  %v374_v14 = vld [vmem:[%s494_s0] sm:$0xe]  ;;  %v133_v17 = vunpack.c.l.b16 %v124_v15 }
   0x6   :  { %v375_v18 = vor.u32 %v374_v14, %v373_v11  ;;  %78 = vmatpush.bf16.msra.mxu0 %v363_v4  ;;  %112 = vmatpush.bf16.msra.mxu1 %v361_v5  ;;  %v36_v19 = vpack.c.b16 %v34_v12, %v34_v12  ;;  %v377_v48 = vld [vmem:[%s495_s2] ss:$0 sm:$0xff]  ;;  %vm275_vm7 = vsmask.f32 7938  ;;  %vm296_vm10 = vsmask.f32 256 }
   0x7   :  { %v43_v16 = vrot.slane %v41_v10, 1  ;;  %165 = vmatpush.bf16.msra.mxu2 %v365_v6  ;;  %227 = vmatpush.bf16.msra.mxu3 %v367_v8  ;;  %v135_v20 = vpack.c.b16 %v133_v17, %v133_v17  ;;  %vm276_vm8 = vmand %vm251_vm4, %vm275_vm7  ;;  %vm280_vm11 = vcmask 261122  }
   0x8   :  { %v137_v21 = vrot.slane %v375_v18, 1  ;;  %v186_v22 = vshrl.u32 %v375_v18, 16  ;;  %v46_v24 = vshll.u32 %v36_v19, 16  ;;  %v189_v25 = vshll.u32 %v375_v18, 16  ;;  %vm297_vm12 = vmand %vm254_vm5, %vm296_vm10 }
   0x9   :  { %v44_v23 = vor.u32 %v43_v16, %v39_v13  ;;  %331 = vmatmul.msk.bf16.vlgmr.msra.gmra.mxu1 %vm64_vm0, %v370_v7  ;;  %v138_v26 = vrot.slane %v135_v20, 1  ;;  %v194_v28 = vshrl.u32 %v135_v20, 16  ;;  %v197_v29 = vshll.u32 %v135_v20, 16  ;;  %v277_v7 = vld [vmem:[%s496_s3] sm:$0xf] }
   0xa   :  { %v188_v27 = vrot.slane %v186_v22, 1  ;;  %v48_v30 = vrot.slane %v46_v24, 1  ;;  %v191_v31 = vrot.slane %v189_v25, 2  ;;  %v50_v39 = vshrl.u32 %v36_v19, 16 }
   0xb   :  { %v139_v32 = vsel %vm136_vm2, %v137_v21, %v138_v26  ;;  %v196_v33 = vrot.slane %v194_v28, 1  ;;  %v199_v34 = vrot.slane %v197_v29, 2 }
   0xc   :  { %v49_v35 = vsel %vm37_vm1, %v44_v23, %v48_v30  ;;  %345 = vmatmul.msk.bf16.vlgmr.msra.gmra.mxu2 %vm64_vm0, %v139_v32  ;;  %v192_v36 = vor.u32 %v191_v31, %v188_v27  ;;  %v298_v23 = vld [vmem:[%s496_s3 + $0x8] sm:$0x1] }
   0xd   :  { %321 = vmatmul.msk.bf16.vlgmr.msra.gmra.mxu0 %vm64_vm0, %v49_v35  ;;  %v200_v37 = vor.u32 %v199_v34, %v196_v33 }
   0xf   :  { %v201_v38 = vsel %vm184_vm3, %v192_v36, %v200_v37 }
  0x10   :  { %359 = vmatmul.msk.bf16.vlgmr.msra.gmra.mxu3 %vm64_vm0, %v201_v38 }
  0x19   :  { %332 = vmatmul.msk.bf16.gmra.mxu1 %vm64_vm0, %v36_v19 }
  0x1c   :  { %346 = vmatmul.msk.bf16.gmra.mxu2 %vm64_vm0, %v138_v26 }
  0x1d   :  { %322 = vmatmul.msk.bf16.gmra.mxu0 %vm64_vm0, %v50_v39 }
  0x20   :  { %360 = vmatmul.msk.bf16.gmra.mxu3 %vm64_vm0, %v196_v33 }
  0x86   :  { %v114_v41 = vpop.f32.mrf.mxu1 }
  0x8a   :  { %v80_v42 = vpop.f32.mrf.mxu0 }
  0x8b   :  { %v115_v43 = vadd.f32 %v114_v41, %v80_v42 }
  0x8e   :  { %v116_v44 = vpop.f32.mrf.mxu1 }
  0x8f   :  { %v167_v45 = vpop.f32.mrf.mxu2 }
  0x90   :  { %v176_v46 = vadd.f32 %v167_v45, %v115_v43 }
  0x92   :  { %v82_v47 = vpop.f32.mrf.mxu0 }
  0x93   :  { %v229_v49 = vpop.f32.mrf.mxu3  ;;  %v117_v51 = vadd.f32 %v116_v44, %v82_v47 }
  0x94   :  { %v238_v50 = vadd.f32 %v229_v49, %v176_v46 }
  0x96   :  { %v245_v52 = vadd.f32 %v377_v48, %v238_v50  ;;  %v119_v53 = vpop.f32.mrf.mxu1 }
  0x97   :  { %v169_v54 = vpop.f32.mrf.mxu2 }
  0x98   :  { %v248_v55 = vmax.f32 %v245_v52, 0.0  ;;  %v177_v56 = vadd.f32 %v169_v54, %v117_v51 }
  0x9a   :  { %v257_v57 = vsel %vm256_vm6, %v248_v55, -inf  ;;  %v265_v58 = vpack.c.bf16 %v248_v55, %v248_v55  ;;  %v85_v59 = vpop.f32.mrf.mxu0 }
  0x9b   :  { %v258_v60 = vrot.slane %v257_v57, 4  ;;  %v231_v61 = vpop.f32.mrf.mxu3  ;;  %v120_v63 = vadd.f32 %v119_v53, %v85_v59 }
  0x9c   :  { %v267_v62 = vshrl.u32 %v265_v58, 16  ;;  %v239_v0 = vadd.f32 %v231_v61, %v177_v56  ;;  %v270_v3 = vshll.u32 %v265_v58, 16 }
  0x9d   :  { %v259_v1 = vmax.f32 %v257_v57, %v258_v60 }
  0x9e   :  { %v269_v2 = vrot.slane %v267_v62, 7  ;;  %v246_v4 = vadd.f32 %v377_v48, %v239_v0  ;;  %v121_v5 = vpop.f32.mrf.mxu1 }
  0x9f   :  { %v260_v6 = vrot.slane %v259_v1, 2  ;;  %v172_v8 = vpop.f32.mrf.mxu2 }
  0xa0   :  { %v272_v9 = vor.u32 %v270_v3, %v269_v2  ;;  %v249_v10 = vmax.f32 %v246_v4, 0.0  ;;  %v178_v11 = vadd.f32 %v172_v8, %v120_v63 }
  0xa1   :  { %v261_v12 = vmax.f32 %v259_v1, %v260_v6 }
  0xa2   :  { %v278_v13 = vsel %vm276_vm8, %v272_v9, %v277_v7  ;;  %v291_v14 = vpack.c.bf16 %v249_v10, %v249_v10  ;;  %v87_v15 = vpop.f32.mrf.mxu0  ;;  %v281_v24 = vsel %vm280_vm11, %v249_v10, -inf }
  0xa3   :  { %v262_v16 = vrot.slane %v261_v12, 1  ;;  %279 = vst [vmem:[%s496_s3] sm:$0xf] %v278_v13  ;;  %v234_v17 = vpop.f32.mrf.mxu3 }
  0xa4   :  { %294 = vst.msk [vmem:[%s496_s3 + $0x4] sm:$0xe] %vm293_vm9, %v291_v14  ;;  %v240_v18 = vadd.f32 %v234_v17, %v178_v11 }
  0xa5   :  { %v263_v19 = vmax.f32 %v261_v12, %v262_v16 }
  0xa6   :  { %v247_v20 = vadd.f32 %v377_v48, %v240_v18 }
  0xa7   :  { %264 = vst.msk [vmem:[%s497_s4] sm:$0x1] %vm254_vm5, %v263_v19  ;;  %v174_v21 = vpop.f32.mrf.mxu2 }
  0xa8   :  { %v250_v22 = vmax.f32 %v247_v20, 0.0 }
  0xaa   :  { %v282_v25 = vsel %vm254_vm5, %v250_v22, -inf  ;;  %v292_v26 = vpack.c.bf16 %v250_v22, %v250_v22 }
  0xab   :  { %v283_v27 = vmax.f32 %v281_v24, %v282_v25  ;;  %v236_v28 = vpop.f32.mrf.mxu3 }
  0xac   :  { %v299_v29 = vsel %vm297_vm12, %v292_v26, %v298_v23 }
  0xad   :  { %v284_v30 = vrot.slane %v283_v27, 4  ;;  %300 = vst [vmem:[%s496_s3 + $0x8] sm:$0x1] %v299_v29 }
  0xaf   :  { %v285_v31 = vmax.f32 %v283_v27, %v284_v30 }
  0xb1   :  { %v286_v32 = vrot.slane %v285_v31, 2 }
  0xb3   :  { %v287_v33 = vmax.f32 %v285_v31, %v286_v32 }
  0xb5   :  { %v288_v34 = vrot.slane %v287_v33, 1 }
  0xb7   :  { %v289_v35 = vmax.f32 %v287_v33, %v288_v34 }
  0xb9   :  { %290 = vst.msk [vmem:[%s497_s4 + $0x1] sm:$0x1] %vm254_vm5, %v289_v35 }

// kernel: convnet_encoder2_forward.5
= control target key start
LH: loop header
LB: loop body
LE: loop exit
PB: predicated region body
PF: predicated region fallthrough
CT: control target
= control target key end

     0   :  { %vm52_vm0 = vcmask 261120   ;;  %vm114_vm1 = vcmask 1046528   ;;  %vm154_vm2 = vsmask.f32 6400  ;;  %vm211_vm3 = vcmask 257024   ;;  %s424_s1 = inlined_call_operand.vmem [shape: bf16[4,32,32], index: 1, kind: input, shape index: {}]   ;;  %s425_s0 = inlined_call_operand.vmem [shape: bf16[18,32], index: 0, kind: input, shape index: {}]   ;;  %s426_s2 = inlined_call_operand.vmem [shape: f32[1,32], index: 2, kind: input, shape index: {}]   ;;  %s427_s3 = inlined_call_operand.vmem [shape: bf16[16,32], index: 3, kind: output, shape index: {0}]   ;;  %s428_s4 = inlined_call_operand.vmem [shape: f32[2,32], index: 4, kind: output, shape index: {1}]  }
   0x1   :  { %v320_v0 = vld [vmem:[%s424_s1 + $0x18] sm:$0xff]  ;;  %v318_v1 = vld [vmem:[%s424_s1 + $0x8] sm:$0xff]  ;;  %v319_v4 = vld [vmem:[%s424_s1 + $0x10] sm:$0xff]  ;;  %v328_v33 = vmov 0   ;;  %vm214_vm4 = vcmask 259072   ;;  %vm239_vm7 = vcmask 260097  }
   0x2   :  { %v323_v2 = vld [vmem:[%s424_s1 + $0x28] sm:$0xff]  ;;  %v325_v3 = vld [vmem:[%s424_s1 + $0x38] sm:$0xff]  ;;  %v317_v5 = vld [vmem:[%s424_s1] sm:$0xff]  ;;  %62 = vmatpush.bf16.msra.mxu0 %v320_v0  ;;  %90 = vmatpush.bf16.msra.mxu1 %v318_v1  ;;  %212 = vst.msk [vmem:[%s427_s3] sm:$0xf] %vm211_vm3, %v328_v33  ;;  %vm222_vm8 = vcmask 253952  }
   0x3   :  { %v322_v6 = vld [vmem:[%s424_s1 + $0x20] sm:$0xff]  ;;  %v324_v7 = vld [vmem:[%s424_s1 + $0x30] sm:$0xff]  ;;  %139 = vmatpush.bf16.msra.mxu2 %v323_v2  ;;  %193 = vmatpush.bf16.msra.mxu3 %v325_v3  ;;  %v100_v11 = vld [vmem:[%s425_s0 + $0x8] sm:$0x1]  ;;  %213 = vst.msk [vmem:[%s427_s3 + $0x4] sm:$0xf] %vm211_vm3, %v328_v33 }
   0x4   :  { %v316_v8 = vld [vmem:[%s425_s0] sm:$0xff]  ;;  %v111_v14 = vunpack.c.l.b16 %v100_v11  ;;  %vm234_vm5 = vsmask.f32 3330 }
   0x5   :  { %v292_v9 = vld [vmem:[%s425_s0] sm:$0xe]  ;;  %v321_v10 = vld [vmem:[%s425_s0] sm:$0xf0]  ;;  %v34_v12 = vshrl.u32 %v316_v8, 16  ;;  %v36_v13 = vshll.u32 %v316_v8, 16  ;;  %vm235_vm6 = vmand %vm211_vm3, %vm234_vm5 }
   0x6   :  { %v293_v15 = vor.u32 %v321_v10, %v292_v9  ;;  %63 = vmatpush.bf16.msra.mxu0 %v319_v4  ;;  %91 = vmatpush.bf16.msra.mxu1 %v317_v5  ;;  %v113_v17 = vpack.c.b16 %v111_v14, %v111_v14  ;;  %v327_v40 = vld [vmem:[%s426_s2] ss:$0 sm:$0xff] }
   0x7   :  { %v38_v16 = vrot.slane %v36_v13, 1  ;;  %140 = vmatpush.bf16.msra.mxu2 %v322_v6  ;;  %194 = vmatpush.bf16.msra.mxu3 %v324_v7 }
   0x8   :  { %v115_v18 = vrot.slane %v293_v15, 1  ;;  %v156_v19 = vshrl.u32 %v293_v15, 16  ;;  %v159_v20 = vshll.u32 %v293_v15, 16  ;;  %v116_v22 = vrot.slane %v113_v17, 1 }
   0x9   :  { %v39_v21 = vor.u32 %v38_v16, %v34_v12  ;;  %v164_v24 = vshrl.u32 %v113_v17, 16  ;;  %285 = vmatmul.msk.bf16.vlgmr.msra.gmra.mxu1 %vm52_vm0, %v316_v8  ;;  %v167_v26 = vshll.u32 %v113_v17, 16  ;;  %v236_v60 = vld [vmem:[%s427_s3] sm:$0xf] }
   0xa   :  { %v158_v23 = vrot.slane %v156_v19, 1  ;;  %v161_v25 = vrot.slane %v159_v20, 2  ;;  %v117_v27 = vsel %vm114_vm1, %v115_v18, %v116_v22  ;;  %v249_v0 = vld [vmem:[%s427_s3 + $0x4] sm:$0xf] }
   0xb   :  { %276 = vmatmul.msk.bf16.vlgmr.msra.gmra.mxu0 %vm52_vm0, %v39_v21  ;;  %v166_v28 = vrot.slane %v164_v24, 1  ;;  %302 = vmatmul.msk.bf16.vlgmr.msra.gmra.mxu2 %vm52_vm0, %v117_v27  ;;  %v169_v30 = vrot.slane %v167_v26, 2 }
   0xc   :  { %v162_v29 = vor.u32 %v161_v25, %v158_v23 }
   0xd   :  { %v170_v31 = vor.u32 %v169_v30, %v166_v28 }
   0xf   :  { %v171_v32 = vsel %vm154_vm2, %v162_v29, %v170_v31 }
  0x10   :  { %315 = vmatmul.msk.bf16.vlgmr.msra.gmra.mxu3 %vm52_vm0, %v171_v32 }
  0x86   :  { %v93_v34 = vpop.f32.mrf.mxu1 }
  0x88   :  { %v65_v35 = vpop.f32.mrf.mxu0 }
  0x89   :  { %v94_v36 = vadd.f32 %v93_v34, %v65_v35 }
  0x8e   :  { %v142_v37 = vpop.f32.mrf.mxu2  ;;  %v95_v39 = vpop.f32.mrf.mxu1 }
  0x8f   :  { %v147_v38 = vadd.f32 %v142_v37, %v94_v36 }
  0x90   :  { %v67_v41 = vpop.f32.mrf.mxu0 }
  0x91   :  { %v96_v44 = vadd.f32 %v95_v39, %v67_v41 }
  0x93   :  { %v196_v42 = vpop.f32.mrf.mxu3 }
  0x94   :  { %v201_v43 = vadd.f32 %v196_v42, %v147_v38 }
  0x96   :  { %v207_v45 = vadd.f32 %v327_v40, %v201_v43  ;;  %v144_v46 = vpop.f32.mrf.mxu2 }
  0x97   :  { %v148_v48 = vadd.f32 %v144_v46, %v96_v44 }
  0x98   :  { %v209_v47 = vmax.f32 %v207_v45, 0.0 }
  0x9a   :  { %v215_v49 = vsel %vm214_vm4, %v209_v47, -inf  ;;  %v224_v50 = vpack.c.bf16 %v209_v47, %v209_v47 }
  0x9b   :  { %v216_v51 = vrot.slane %v215_v49, 4  ;;  %v198_v52 = vpop.f32.mrf.mxu3 }
  0x9c   :  { %v226_v53 = vshrl.u32 %v224_v50, 16  ;;  %v202_v54 = vadd.f32 %v198_v52, %v148_v48  ;;  %v229_v57 = vshll.u32 %v224_v50, 16 }
  0x9d   :  { %v217_v55 = vmax.f32 %v215_v49, %v216_v51 }
  0x9e   :  { %v228_v56 = vrot.slane %v226_v53, 7  ;;  %v208_v58 = vadd.f32 %v327_v40, %v202_v54 }
  0x9f   :  { %v218_v59 = vrot.slane %v217_v55, 2 }
  0xa0   :  { %v231_v61 = vor.u32 %v229_v57, %v228_v56  ;;  %v210_v62 = vmax.f32 %v208_v58, 0.0 }
  0xa1   :  { %v219_v63 = vmax.f32 %v217_v55, %v218_v59 }
  0xa2   :  { %v237_v1 = vsel %vm235_vm6, %v231_v61, %v236_v60  ;;  %v240_v2 = vsel %vm239_vm7, %v210_v62, -inf  ;;  %v248_v3 = vpack.c.bf16 %v210_v62, %v210_v62 }
  0xa3   :  { %v220_v4 = vrot.slane %v219_v63, 1  ;;  %238 = vst [vmem:[%s427_s3] sm:$0xf] %v237_v1  ;;  %v241_v5 = vrot.slane %v240_v2, 4 }
  0xa4   :  { %v250_v6 = vsel %vm235_vm6, %v248_v3, %v249_v0 }
  0xa5   :  { %v221_v7 = vmax.f32 %v219_v63, %v220_v4  ;;  %v242_v8 = vmax.f32 %v240_v2, %v241_v5  ;;  %251 = vst [vmem:[%s427_s3 + $0x4] sm:$0xf] %v250_v6 }
  0xa7   :  { %223 = vst.msk [vmem:[%s428_s4] sm:$0x1] %vm222_vm8, %v221_v7  ;;  %v243_v9 = vrot.slane %v242_v8, 2 }
  0xa9   :  { %v244_v10 = vmax.f32 %v242_v8, %v243_v9 }
  0xab   :  { %v245_v11 = vrot.slane %v244_v10, 1 }
  0xad   :  { %v246_v12 = vmax.f32 %v244_v10, %v245_v11 }
  0xaf   :  { %247 = vst.msk [vmem:[%s428_s4 + $0x1] sm:$0x1] %vm222_vm8, %v246_v12 }

// kernel: convnet_encoder2_forward.7
= control target key start
LH: loop header
LB: loop body
LE: loop exit
PB: predicated region body
PF: predicated region fallthrough
CT: control target
= control target key end

     0   :  { %s460_s0 = inlined_call_operand.vmem [shape: bf16[14,32], index: 0, kind: input, shape index: {}]   ;;  %s461_s1 = inlined_call_operand.vmem [shape: bf16[4,32,32], index: 1, kind: input, shape index: {}]   ;;  %s462_s2 = inlined_call_operand.vmem [shape: f32[1,32], index: 2, kind: input, shape index: {}]   ;;  %s463_s3 = inlined_call_operand.hbm [shape: bf16[12,32], index: 3, kind: output, shape index: {0}]   ;;  %s464_s4 = inlined_call_operand.vmem [shape: f32[2,32], index: 4, kind: output, shape index: {1}]  }
   0x1   :  { %v330_v0 = vld [vmem:[%s461_s1 + $0x18] sm:$0xff]  ;;  %v328_v1 = vld [vmem:[%s461_s1 + $0x8] sm:$0xff]  ;;  %v329_v4 = vld [vmem:[%s461_s1 + $0x10] sm:$0xff] }
   0x2   :  { %v333_v2 = vld [vmem:[%s461_s1 + $0x28] sm:$0xff]  ;;  %v335_v3 = vld [vmem:[%s461_s1 + $0x38] sm:$0xff]  ;;  %v327_v5 = vld [vmem:[%s461_s1] sm:$0xff]  ;;  %63 = vmatpush.bf16.msra.mxu0 %v330_v0  ;;  %91 = vmatpush.bf16.msra.mxu1 %v328_v1 }
   0x3   :  { %v332_v6 = vld [vmem:[%s461_s1 + $0x20] sm:$0xff]  ;;  %v334_v7 = vld [vmem:[%s461_s1 + $0x30] sm:$0xff]  ;;  %133 = vmatpush.bf16.msra.mxu2 %v333_v2  ;;  %177 = vmatpush.bf16.msra.mxu3 %v335_v3 }
   0x4   :  { %v276_v8 = vld [vmem:[%s460_s0] sm:$0xf]  ;;  %v326_v9 = vld [vmem:[%s460_s0] sm:$0x30] }
   0x5   :  { %v302_v10 = vld [vmem:[%s460_s0] sm:$0xe]  ;;  %v331_v11 = vld [vmem:[%s460_s0] sm:$0x70]  ;;  %v277_v12 = vor.u32 %v326_v9, %v276_v8 }
   0x6   :  { %v303_v13 = vor.u32 %v331_v11, %v302_v10 }
   0x7   :  { %10 = vsyncpa [#allocation3], 0  ;;  %vm53_vm0 = vcmask 261120   ;;  %64 = vmatpush.bf16.msra.mxu0 %v329_v4  ;;  %92 = vmatpush.bf16.msra.mxu1 %v327_v5  ;;  %v35_v14 = vshrl.u32 %v277_v12, 16  ;;  %v37_v15 = vshll.u32 %v277_v12, 16  ;;  %vm195_vm1 = vcmask 257024  }
   0x8   :  { %v111_v16 = vrot.slane %v303_v13, 1  ;;  %v149_v17 = vshrl.u32 %v303_v13, 16  ;;  %134 = vmatpush.bf16.msra.mxu2 %v332_v6  ;;  %178 = vmatpush.bf16.msra.mxu3 %v334_v7  ;;  %v152_v18 = vshll.u32 %v303_v13, 16  ;;  %v367_v24 = vmov 0   ;;  %v340_v30 = vld [vmem:[%s462_s2] ss:$0 sm:$0xff] }
   0x9   :  { %v39_v19 = vrot.slane %v37_v15, 1  ;;  %196 = vst.msk [vmem:[#allocation2] sm:$0xf] %vm195_vm1, %v367_v24  ;;  %vm197_vm2 = vcmask 254976   ;;  %vm236_vm3 = vcmask 257027   ;;  %vm217_vm6 = vcmask 256000  }
   0xa   :  { %v151_v20 = vrot.slane %v149_v17, 1  ;;  %295 = vmatmul.msk.bf16.vlgmr.msra.gmra.mxu1 %vm53_vm0, %v277_v12  ;;  %v154_v21 = vrot.slane %v152_v18, 2  ;;  %198 = vst.msk [vmem:[#allocation2 + $0x4] sm:$0x3] %vm197_vm2, %v367_v24  ;;  %vm237_vm4 = vsmask.f32 7950 }
   0xb   :  { %v40_v22 = vor.u32 %v39_v19, %v35_v14  ;;  %312 = vmatmul.msk.bf16.vlgmr.msra.gmra.mxu2 %vm53_vm0, %v111_v16  ;;  %vm238_vm5 = vmand %vm236_vm3, %vm237_vm4  ;;  %vm218_vm7 = vsmask.f32 2306  ;;  %vm243_vm8 = vsmask.f32 1280  ;;  %vm223_vm10 = vcmask 261127   ;;  %s368_s2 = smov [#allocation2]  }
   0xc   :  { %v155_v23 = vor.u32 %v154_v21, %v151_v20  ;;  %vm443_vm9 = vmand %vm217_vm6, %vm218_vm7  ;;  %s252_s13 = sshll.u32 %s368_s2, 4  ;;  %s254_s16 = sshll.u32 %s463_s3, 4  ;;  %vm206_vm12 = vcmask 253952   ;;  %s253_s13 = int_to_ptr.vmem [resolvable:$true] %s252_s13  ;;  %s255_s16 = int_to_ptr.hbm [resolvable:$true] %s254_s16 }
   0xd   :  { %286 = vmatmul.msk.bf16.vlgmr.msra.gmra.mxu0 %vm53_vm0, %v40_v22  ;;  %vm244_vm11 = vmand %vm197_vm2, %vm243_vm8  ;;  %s369_s3 = smov 64   ;;  %s370_s17 = smov 4  }
   0xe   :  { %325 = vmatmul.msk.bf16.vlgmr.msra.gmra.mxu3 %vm53_vm0, %v155_v23 }
  0x10   :  { %v239_v39 = vld [vmem:[#allocation2] sm:$0x8]  ;;  %v220_v54 = vld [vmem:[#allocation2] sm:$0x7] }
  0x11   :  { %v245_v58 = vld [vmem:[#allocation2 + $0x4] sm:$0x3] }
  0x87   :  { %v94_v25 = vpop.f32.mrf.mxu1 }
  0x8a   :  { %v66_v26 = vpop.f32.mrf.mxu0 }
  0x8b   :  { %v95_v27 = vadd.f32 %v94_v25, %v66_v26 }
  0x8e   :  { %v136_v28 = vpop.f32.mrf.mxu2 }
  0x8f   :  { %v141_v29 = vadd.f32 %v136_v28, %v95_v27  ;;  %v96_v34 = vpop.f32.mrf.mxu1 }
  0x91   :  { %v180_v31 = vpop.f32.mrf.mxu3 }
  0x92   :  { %v185_v32 = vadd.f32 %v180_v31, %v141_v29  ;;  %v68_v33 = vpop.f32.mrf.mxu0 }
  0x93   :  { %v97_v36 = vadd.f32 %v96_v34, %v68_v33 }
  0x94   :  { %v191_v35 = vadd.f32 %v340_v30, %v185_v32 }
  0x96   :  { %v193_v37 = vmax.f32 %v191_v35, 0.0  ;;  %v138_v38 = vpop.f32.mrf.mxu2 }
  0x97   :  { %v142_v40 = vadd.f32 %v138_v38, %v97_v36 }
  0x98   :  { %v199_v41 = vsel %vm195_vm1, %v193_v37, -inf  ;;  %v208_v42 = vpack.c.bf16 %v193_v37, %v193_v37  ;;  %v224_v60 = vsel %vm223_vm10, %v193_v37, -inf }
  0x99   :  { %v200_v43 = vrot.slane %v199_v41, 4  ;;  %v182_v44 = vpop.f32.mrf.mxu3 }
  0x9a   :  { %v210_v45 = vshrl.u32 %v208_v42, 16  ;;  %v240_v46 = vsel %vm238_vm5, %v208_v42, %v239_v39  ;;  %v186_v47 = vadd.f32 %v182_v44, %v142_v40  ;;  %v213_v50 = vshll.u32 %v208_v42, 16 }
  0x9b   :  { %v201_v48 = vmax.f32 %v199_v41, %v200_v43  ;;  %241 = vst [vmem:[#allocation2] sm:$0x8] %v240_v46 }
  0x9c   :  { %v212_v49 = vrot.slane %v210_v45, 7  ;;  %v192_v51 = vadd.f32 %v340_v30, %v186_v47 }
  0x9d   :  { %v202_v52 = vrot.slane %v201_v48, 2 }
  0x9e   :  { %v194_v55 = vmax.f32 %v192_v51, 0.0  ;;  %v215_v56 = vor.u32 %v213_v50, %v212_v49 }
  0x9f   :  { %v203_v57 = vmax.f32 %v201_v48, %v202_v52 }
  0xa0   :  { %v221_v59 = vsel %vm443_vm9, %v215_v56, %v220_v54  ;;  %v226_v61 = vsel %vm217_vm6, %v194_v55, -inf  ;;  %v235_v62 = vpack.c.bf16 %v194_v55, %v194_v55 }
  0xa1   :  { %v204_v63 = vrot.slane %v203_v57, 1  ;;  %222 = vst [vmem:[#allocation2] sm:$0x7] %v221_v59  ;;  %v227_v0 = vmax.f32 %v224_v60, %v226_v61 }
  0xa2   :  { %v246_v1 = vsel %vm244_vm11, %v235_v62, %v245_v58 }
  0xa3   :  { %v205_v2 = vmax.f32 %v203_v57, %v204_v63  ;;  %v228_v3 = vrot.slane %v227_v0, 4  ;;  %247 = vst [vmem:[#allocation2 + $0x4] sm:$0x3] %v246_v1 }
  0xa4   :  { %260 = dma.vmem_to_hbm [thread:$0]  %s253_s13, 128, %s255_s16, [#allocation3], %s369_s3, %s369_s3, %s370_s17  }
  0xa5   :  { %207 = vst.msk [vmem:[%s464_s4] sm:$0x1] %vm206_vm12, %v205_v2  ;;  %v229_v4 = vmax.f32 %v227_v0, %v228_v3 }
  0xa7   :  { %v230_v5 = vrot.slane %v229_v4, 2 }
  0xa9   :  { %v231_v6 = vmax.f32 %v229_v4, %v230_v5 }
  0xab   :  { %v232_v7 = vrot.slane %v231_v6, 1 }
  0xad   :  { %v233_v8 = vmax.f32 %v231_v6, %v232_v7 }
  0xaf   :  { %234 = vst.msk [vmem:[%s464_s4 + $0x1] sm:$0x1] %vm206_vm12, %v233_v8 }
  0xb0   :  { %365 = dma.done.wait [#allocation3], 128  }
  0xb1   :  { %366 = vsyncadd [#allocation3], 4294967168 }
  0xb2   :  { %269 = vsyncpa [#allocation3], 1 }

</bundles_post_ra>
